<compile_context>
chip_gen: v6e
topology: v6e:2x2x1
jax: 0.10.0
libtpu: 0.0.40
codegen_flags: <defaults>
</compile_context>

<pallas_src>
import functools

import jax
import jax.numpy as jnp
from jax.experimental import pallas as pl
from jax.experimental.pallas import tpu as pltpu

LANE = 128


def _round_up(x, m):
    return (x + m - 1) // m * m


def dqn_mlp_kernel(x_ref, w1_ref, b1_ref, w2_ref, b2_ref, w3_ref, b3_ref, o_ref):
    # x_ref: (TB, nin) f32 tile; weights bf16; biases f32; output (TB, nact) f32.
    x = x_ref[...].astype(jnp.bfloat16)
    h1 = jnp.dot(x, w1_ref[...], preferred_element_type=jnp.float32) + b1_ref[...]
    h1 = jnp.maximum(h1, 0.0).astype(jnp.bfloat16)
    h2 = jnp.dot(h1, w2_ref[...], preferred_element_type=jnp.float32) + b2_ref[...]
    h2 = jnp.maximum(h2, 0.0).astype(jnp.bfloat16)
    out = jnp.dot(h2, w3_ref[...], preferred_element_type=jnp.float32) + b3_ref[...]
    o_ref[...] = out


def _pad2(a, rows, cols):
    return jnp.pad(a, ((0, rows - a.shape[0]), (0, cols - a.shape[1])))


def _pick_tile(B, block_b):
    """Batch tile: >=2 tiles for large batches (v7x dual-TC), multiple of 256,
    capped at block_b; small batches use a single 16-row-aligned tile."""
    if B <= 256:
        return _round_up(max(B, 1), 16)
    return min(block_b, _round_up(pl.cdiv(B, 2), 256))


@functools.partial(jax.jit, static_argnames=("block_b",))
def dqn_forward(x, params, *, block_b=2048):
    """Pallas DQN forward. x: (B, num_inputs) f32. Returns (B, num_actions) f32."""
    w1, b1, w2, b2, w3, b3 = params
    B, nin = x.shape
    nh1, nh2, nact = w1.shape[1], w2.shape[1], w3.shape[1]

    # Hidden dims lane-padded to 128 (zero padding keeps the math exact).
    H1 = _round_up(nh1, LANE)
    H2 = _round_up(nh2, LANE)

    TB = _pick_tile(B, block_b)
    Bp = _round_up(B, TB)

    # x: pad batch rows only, keep f32 and the true (narrow) feature dim.
    xp = jnp.pad(x, ((0, Bp - B), (0, 0))) if Bp != B else x

    # bf16 weights for the MXU; biases stay f32 (added to the f32 accumulator).
    w1p = _pad2(w1, nin, H1).astype(jnp.bfloat16)   # (nin, H1)
    w2p = _pad2(w2, H1, H2).astype(jnp.bfloat16)    # (H1, H2)
    w3p = _pad2(w3, H2, nact).astype(jnp.bfloat16)  # (H2, nact)  -- narrow output
    b1p = _pad2(b1, 1, H1)
    b2p = _pad2(b2, 1, H2)
    b3p = b3.reshape(1, nact)

    grid = (Bp // TB,)
    # Weights/biases: full-array blocks with a constant (0,0) block index
    # -> fetched once, VMEM-resident across the whole batch sweep.
    resident = lambda a: pl.BlockSpec(a.shape, lambda i: (0, 0))

    flops = 2 * Bp * (nin * H1 + H1 * H2 + H2 * nact)
    bytes_accessed = (
        Bp * nin * 4                                   # x (f32, narrow)
        + (w1p.size + w2p.size + w3p.size) * 2         # bf16 weights
        + (b1p.size + b2p.size + b3p.size) * 4         # f32 biases
        + Bp * nact * 4                                 # narrow f32 output
    )

    out = pl.pallas_call(
        dqn_mlp_kernel,
        out_shape=jax.ShapeDtypeStruct((Bp, nact), jnp.float32),
        grid=grid,
        in_specs=[
            pl.BlockSpec((TB, nin), lambda i: (i, 0)),  # x: pipelined batch tiles
            resident(w1p), resident(b1p),
            resident(w2p), resident(b2p),
            resident(w3p), resident(b3p),
        ],
        out_specs=pl.BlockSpec((TB, nact), lambda i: (i, 0)),
        compiler_params=pltpu.CompilerParams(
            dimension_semantics=("parallel",),  # batch tiles shard across v7x's 2 TCs
        ),
        cost_estimate=pl.CostEstimate(
            flops=flops, transcendentals=0, bytes_accessed=bytes_accessed
        ),
    )(xp, w1p, b1p, w2p, b2p, w3p, b3p)

    return out if Bp == B else out[:B]


def init_params(key, num_inputs, num_actions, hidden=64):
    """Deterministic synthetic init (mirrors the nn.Linear shapes of DQNNetwork)."""
    ks = jax.random.split(key, 6)

    def lin(kw, kb, fan_in, fan_out):
        bound = 1.0 / jnp.sqrt(fan_in)
        # Stored as (in, out) so the kernel computes x @ W (== PyTorch x @ W.T).
        w = jax.random.uniform(kw, (fan_in, fan_out), jnp.float32, -bound, bound)
        b = jax.random.uniform(kb, (1, fan_out), jnp.float32, -bound, bound)
        return w, b

    w1, b1 = lin(ks[0], ks[1], num_inputs, hidden)
    w2, b2 = lin(ks[2], ks[3], hidden, hidden)
    w3, b3 = lin(ks[4], ks[5], hidden, num_actions)
    return (w1, b1, w2, b2, w3, b3)


def reference_forward(x, params, compute_dtype=jnp.float32):
    """Pure-JAX reference. compute_dtype=bf16 mirrors the kernel's MXU numerics."""
    w1, b1, w2, b2, w3, b3 = params
    cd = compute_dtype
    h1 = jnp.maximum(
        jnp.dot(x.astype(cd), w1.astype(cd), preferred_element_type=jnp.float32) + b1, 0.0)
    h2 = jnp.maximum(
        jnp.dot(h1.astype(cd), w2.astype(cd), preferred_element_type=jnp.float32) + b2, 0.0)
    return jnp.dot(h2.astype(cd), w3.astype(cd), preferred_element_type=jnp.float32) + b3


if __name__ == "__main__":
    num_inputs = 16
    num_actions = 4

    key = jax.random.PRNGKey(0)
    kx, kp, kx2 = jax.random.split(key, 3)
    params = init_params(kp, num_inputs, num_actions)

    # Small-batch check (typical single-state inference path): TB=16, grid=(1,).
    batch = 8
    x = jax.random.normal(kx, (batch, num_inputs), jnp.float32)
    out = jax.block_until_ready(dqn_forward(x, params))
    assert out.shape == (batch, num_actions)
    ref_bf16 = reference_forward(x, params, jnp.bfloat16)
    ref_f32 = reference_forward(x, params, jnp.float32)
    assert jnp.allclose(out, ref_bf16, atol=1e-3, rtol=1e-3), "mismatch vs bf16 reference"
    assert jnp.allclose(out, ref_f32, atol=5e-2, rtol=5e-2), "drift vs f32 reference too large"

    # Larger batch exercises the tiled batch grid (TB=256, grid=(2,), parallel axis).
    batch2 = 512
    x2 = jax.random.normal(kx2, (batch2, num_inputs), jnp.float32)
    out2 = jax.block_until_ready(dqn_forward(x2, params))
    assert out2.shape == (batch2, num_actions)
    ref2 = reference_forward(x2, params, jnp.bfloat16)
    assert jnp.allclose(out2, ref2, atol=1e-3, rtol=1e-3), "mismatch vs bf16 reference (tiled)"

    print("KERNEL_OK")
</pallas_src>

<mosaic_0001>
module attributes {stable_mosaic.version = 11 : i64} {
  func.func @dqn_mlp_kernel(%arg0: i32, %arg1: memref<16x16xf32, #tpu.memory_space<vmem>>, %arg2: memref<16x128xbf16, #tpu.memory_space<vmem>>, %arg3: memref<1x128xf32, #tpu.memory_space<vmem>>, %arg4: memref<128x128xbf16, #tpu.memory_space<vmem>>, %arg5: memref<1x128xf32, #tpu.memory_space<vmem>>, %arg6: memref<128x4xbf16, #tpu.memory_space<vmem>>, %arg7: memref<1x4xf32, #tpu.memory_space<vmem>>, %arg8: memref<16x4xf32, #tpu.memory_space<vmem>>) attributes {dimension_semantics = [#tpu.dimension_semantics<parallel>], iteration_bounds = array<i64: 1>, scalar_prefetch = 0 : i64, scratch_operands = 0 : i64, tpu.core_type = #tpu.core_type<tc>, window_params = [{transform_indices = @transform_0, window_bounds = array<i64: 16, 16>}, {pipeline_mode = #tpu.pipeline_mode<synchronous>, transform_indices = @transform_1, window_bounds = array<i64: 16, 128>}, {pipeline_mode = #tpu.pipeline_mode<synchronous>, transform_indices = @transform_2, window_bounds = array<i64: 1, 128>}, {pipeline_mode = #tpu.pipeline_mode<synchronous>, transform_indices = @transform_3, window_bounds = array<i64: 128, 128>}, {pipeline_mode = #tpu.pipeline_mode<synchronous>, transform_indices = @transform_4, window_bounds = array<i64: 1, 128>}, {pipeline_mode = #tpu.pipeline_mode<synchronous>, transform_indices = @transform_5, window_bounds = array<i64: 128, 4>}, {pipeline_mode = #tpu.pipeline_mode<synchronous>, transform_indices = @transform_6, window_bounds = array<i64: 1, 4>}, {transform_indices = @transform_7, window_bounds = array<i64: 16, 4>}]} {
    %c0 = arith.constant 0 : index
    %c0_0 = arith.constant 0 : index
    %0 = vector.load %arg1[%c0, %c0_0] : memref<16x16xf32, #tpu.memory_space<vmem>>, vector<16x16xf32>
    %1 = arith.truncf %0 : vector<16x16xf32> to vector<16x16xbf16>
    %c0_1 = arith.constant 0 : index
    %c0_2 = arith.constant 0 : index
    %2 = vector.load %arg2[%c0_1, %c0_2] : memref<16x128xbf16, #tpu.memory_space<vmem>>, vector<16x128xbf16>
    %cst = arith.constant dense<0.000000e+00> : vector<16x128xf32>
    %3 = tpu.matmul %1, %2, %cst {dimension_numbers = #tpu.dot_dimension_numbers<[1], [0], [0], [1], [0, 0, 1, 1], [], []>} : vector<16x16xbf16>, vector<16x128xbf16>, vector<16x128xf32> -> vector<16x128xf32>
    %c0_3 = arith.constant 0 : index
    %c0_4 = arith.constant 0 : index
    %4 = vector.load %arg3[%c0_3, %c0_4] : memref<1x128xf32, #tpu.memory_space<vmem>>, vector<1x128xf32>
    %5 = vector.broadcast %4 : vector<1x128xf32> to vector<16x128xf32>
    %6 = arith.addf %3, %5 : vector<16x128xf32>
    %cst_5 = arith.constant 0.000000e+00 : f32
    %7 = vector.broadcast %cst_5 : f32 to vector<16x128xf32>
    %8 = arith.maximumf %6, %7 : vector<16x128xf32>
    %9 = arith.truncf %8 : vector<16x128xf32> to vector<16x128xbf16>
    %c0_6 = arith.constant 0 : index
    %c0_7 = arith.constant 0 : index
    %10 = vector.load %arg4[%c0_6, %c0_7] : memref<128x128xbf16, #tpu.memory_space<vmem>>, vector<128x128xbf16>
    %cst_8 = arith.constant dense<0.000000e+00> : vector<16x128xf32>
    %11 = tpu.matmul %9, %10, %cst_8 {dimension_numbers = #tpu.dot_dimension_numbers<[1], [0], [0], [1], [0, 0, 1, 1], [], []>} : vector<16x128xbf16>, vector<128x128xbf16>, vector<16x128xf32> -> vector<16x128xf32>
    %c0_9 = arith.constant 0 : index
    %c0_10 = arith.constant 0 : index
    %12 = vector.load %arg5[%c0_9, %c0_10] : memref<1x128xf32, #tpu.memory_space<vmem>>, vector<1x128xf32>
    %13 = vector.broadcast %12 : vector<1x128xf32> to vector<16x128xf32>
    %14 = arith.addf %11, %13 : vector<16x128xf32>
    %cst_11 = arith.constant 0.000000e+00 : f32
    %15 = vector.broadcast %cst_11 : f32 to vector<16x128xf32>
    %16 = arith.maximumf %14, %15 : vector<16x128xf32>
    %17 = arith.truncf %16 : vector<16x128xf32> to vector<16x128xbf16>
    %c0_12 = arith.constant 0 : index
    %c0_13 = arith.constant 0 : index
    %18 = vector.load %arg6[%c0_12, %c0_13] : memref<128x4xbf16, #tpu.memory_space<vmem>>, vector<128x4xbf16>
    %cst_14 = arith.constant dense<0.000000e+00> : vector<16x4xf32>
    %19 = tpu.matmul %17, %18, %cst_14 {dimension_numbers = #tpu.dot_dimension_numbers<[1], [0], [0], [1], [0, 0, 1, 1], [], []>} : vector<16x128xbf16>, vector<128x4xbf16>, vector<16x4xf32> -> vector<16x4xf32>
    %c0_15 = arith.constant 0 : index
    %c0_16 = arith.constant 0 : index
    %20 = vector.load %arg7[%c0_15, %c0_16] : memref<1x4xf32, #tpu.memory_space<vmem>>, vector<1x4xf32>
    %21 = vector.broadcast %20 : vector<1x4xf32> to vector<16x4xf32>
    %22 = arith.addf %19, %21 : vector<16x4xf32>
    %c0_17 = arith.constant 0 : index
    %c0_18 = arith.constant 0 : index
    %23 = vector.load %arg8[%c0_17, %c0_18] : memref<16x4xf32, #tpu.memory_space<vmem>>, vector<16x4xf32>
    tpu.vector_store %arg8[%c0_17, %c0_18], %22 {strides = array<i32>} : memref<16x4xf32, #tpu.memory_space<vmem>>, vector<16x4xf32>,
    return
  }
  func.func @transform_0(%arg0: i32) -> (i32, i32) {
    %c0_i32 = arith.constant 0 : i32
    %c0_i32_0 = arith.constant 0 : i32
    return %arg0, %c0_i32 : i32, i32
  }
  func.func @transform_1(%arg0: i32) -> (i32, i32) {
    %c0_i32 = arith.constant 0 : i32
    %c0_i32_0 = arith.constant 0 : i32
    %c0_i32_1 = arith.constant 0 : i32
    return %c0_i32, %c0_i32_0 : i32, i32
  }
  func.func @transform_2(%arg0: i32) -> (i32, i32) {
    %c0_i32 = arith.constant 0 : i32
    %c0_i32_0 = arith.constant 0 : i32
    %c0_i32_1 = arith.constant 0 : i32
    return %c0_i32, %c0_i32_0 : i32, i32
  }
  func.func @transform_3(%arg0: i32) -> (i32, i32) {
    %c0_i32 = arith.constant 0 : i32
    %c0_i32_0 = arith.constant 0 : i32
    %c0_i32_1 = arith.constant 0 : i32
    return %c0_i32, %c0_i32_0 : i32, i32
  }
  func.func @transform_4(%arg0: i32) -> (i32, i32) {
    %c0_i32 = arith.constant 0 : i32
    %c0_i32_0 = arith.constant 0 : i32
    %c0_i32_1 = arith.constant 0 : i32
    return %c0_i32, %c0_i32_0 : i32, i32
  }
  func.func @transform_5(%arg0: i32) -> (i32, i32) {
    %c0_i32 = arith.constant 0 : i32
    %c0_i32_0 = arith.constant 0 : i32
    %c0_i32_1 = arith.constant 0 : i32
    return %c0_i32, %c0_i32_0 : i32, i32
  }
  func.func @transform_6(%arg0: i32) -> (i32, i32) {
    %c0_i32 = arith.constant 0 : i32
    %c0_i32_0 = arith.constant 0 : i32
    %c0_i32_1 = arith.constant 0 : i32
    return %c0_i32, %c0_i32_0 : i32, i32
  }
  func.func @transform_7(%arg0: i32) -> (i32, i32) {
    %c0_i32 = arith.constant 0 : i32
    %c0_i32_0 = arith.constant 0 : i32
    return %arg0, %c0_i32 : i32, i32
  }
}

</mosaic_0001>

<bundles_post_ra>
// kernel: dqn_forward.1
= control target key start
LH: loop header
LB: loop body
LE: loop exit
PB: predicated region body
PF: predicated region fallthrough
CT: control target
= control target key end

     0   :  { %v433_v0 = vmov 0.0   ;;  %vm434_vm0 = vmmov 0   ;;  %vm45_vm1 = vcmask 130048   ;;  %vm320_vm2 = vcmask 31744   ;;  %s570_s1 = inlined_call_operand.vmem [shape: bf16[16,128], index: 1, kind: input, shape index: {}]   ;;  %s571_s0 = inlined_call_operand.vmem [shape: f32[16,16], index: 0, kind: input, shape index: {}]   ;;  %s572_s3 = inlined_call_operand.vmem [shape: bf16[128,128], index: 3, kind: input, shape index: {}]   ;;  %s573_s5 = inlined_call_operand.vmem [shape: bf16[128,4], index: 5, kind: input, shape index: {}]   ;;  %s574_s2 = inlined_call_operand.vmem [shape: f32[1,128], index: 2, kind: input, shape index: {}]   ;;  %s575_s4 = inlined_call_operand.vmem [shape: f32[1,128], index: 4, kind: input, shape index: {}]   ;;  %s576_s6 = inlined_call_operand.vmem [shape: f32[1,4], index: 6, kind: input, shape index: {}]   ;;  %s577_s7 = inlined_call_operand.vmem [shape: f32[16,4], index: 7, kind: output, shape index: {}]  }
   0x1   :  { %368 = vmatprep.subr.bf16.mxu0 %v433_v0  ;;  %v416_v1 = vld [vmem:[%s570_s1] sm:$0xff]   ;;  %370 = vmatprep.mubr.msk.bf16.mxu0 %vm434_vm0, %v433_v0  ;;  %v28_v3 = vld [vmem:[%s571_s0 + $0x8] sm:$0xff]  ;;  %v417_v5 = vld [vmem:[%s572_s3 + $0x38] sm:$0xff]  }
   0x2   :  { %v27_v2 = vld [vmem:[%s571_s0] sm:$0xff]  ;;  %374 = vmatprep.subr.bf16.mxu1 %v433_v0  ;;  %390 = vmatprep.mubr.msk.bf16.mxu1 %vm434_vm0, %v433_v0  ;;  %v418_v6 = vld [vmem:[%s572_s3 + $0x30] sm:$0xff]   ;;  %v419_v7 = vld [vmem:[%s572_s3 + $0x28] sm:$0xff]  }
   0x3   :  { %369 = vmatpush3.bf16.msra.mxu0 %v416_v1  ;;  %v29_v4 = vpack.c.bf16 %v28_v3, %v27_v2  ;;  %375 = vmatpush3.bf16.msra.mxu1 %v417_v5  ;;  %v420_v8 = vld [vmem:[%s572_s3 + $0x20] sm:$0xff]   ;;  %v421_v9 = vld [vmem:[%s572_s3 + $0x18] sm:$0xff]   ;;  %v422_v10 = vld [vmem:[%s572_s3 + $0x10] sm:$0xff]  }
   0x4   :  { %394 = vmatprep.subr.bf16.mxu0 %v433_v0  ;;  %376 = vmatprep.subr.bf16.mxu1 %v433_v0  ;;  %v423_v11 = vld [vmem:[%s572_s3 + $0x8] sm:$0xff]   ;;  %v424_v12 = vld [vmem:[%s572_s3] sm:$0xff]   ;;  %v425_v13 = vld [vmem:[%s573_s5 + $0x38] sm:$0xff]  }
   0x5   :  { %v426_v14 = vld [vmem:[%s573_s5 + $0x30] sm:$0xff]   ;;  %v427_v15 = vld [vmem:[%s573_s5 + $0x28] sm:$0xff]   ;;  %v428_v16 = vld [vmem:[%s573_s5 + $0x20] sm:$0xff]  }
   0x6   :  { %371 = vmatmul.mubr.msk.bf16.vlgmr.msra.gmra.mxu0 %vm45_vm1, %v29_v4  ;;  %v429_v17 = vld [vmem:[%s573_s5 + $0x18] sm:$0xff]   ;;  %v327_v18 = vld [vmem:[%s574_s2] ss:$0 sm:$0xff]  ;;  %v430_v28 = vld [vmem:[%s573_s5 + $0x10] sm:$0xff]  }
   0x7   :  { %410 = vmatprep.mubr.msk.bf16.mxu0 %vm434_vm0, %v433_v0  ;;  %377 = vmatpush3.bf16.msra.mxu1 %v418_v6  ;;  %v431_v29 = vld [vmem:[%s573_s5 + $0x8] sm:$0xff]   ;;  %v432_v30 = vld [vmem:[%s573_s5] sm:$0xff]  }
   0x8   :  { %378 = vmatprep.subr.bf16.mxu1 %v433_v0  ;;  %395 = vmatpush3.bf16.msra.mxu0 %v425_v13  ;;  %v330_v31 = vld [vmem:[%s575_s4] ss:$0 sm:$0xff] }
   0x9   :  { %396 = vmatprep.subr.bf16.mxu0 %v433_v0  ;;  %v339_v41 = vld [vmem:[%s576_s6] ss:$0 sm:$0xff] }
   0xb   :  { %379 = vmatpush3.bf16.msra.mxu1 %v419_v7 }
   0xc   :  { %380 = vmatprep.subr.bf16.mxu1 %v433_v0  ;;  %397 = vmatpush3.bf16.msra.mxu0 %v426_v14 }
   0xd   :  { %398 = vmatprep.subr.bf16.mxu0 %v433_v0 }
   0xf   :  { %381 = vmatpush3.bf16.msra.mxu1 %v420_v8 }
  0x10   :  { %382 = vmatprep.subr.bf16.mxu1 %v433_v0  ;;  %399 = vmatpush3.bf16.msra.mxu0 %v427_v15 }
  0x11   :  { %400 = vmatprep.subr.bf16.mxu0 %v433_v0 }
  0x13   :  { %383 = vmatpush3.bf16.msra.mxu1 %v421_v9 }
  0x14   :  { %384 = vmatprep.subr.bf16.mxu1 %v433_v0  ;;  %401 = vmatpush3.bf16.msra.mxu0 %v428_v16 }
  0x15   :  { %402 = vmatprep.subr.bf16.mxu0 %v433_v0 }
  0x17   :  { %385 = vmatpush3.bf16.msra.mxu1 %v422_v10 }
  0x18   :  { %386 = vmatprep.subr.bf16.mxu1 %v433_v0  ;;  %403 = vmatpush3.bf16.msra.mxu0 %v429_v17 }
  0x19   :  { %404 = vmatprep.subr.bf16.mxu0 %v433_v0 }
  0x1b   :  { %387 = vmatpush3.bf16.msra.mxu1 %v423_v11 }
  0x1c   :  { %388 = vmatprep.subr.bf16.mxu1 %v433_v0  ;;  %405 = vmatpush3.bf16.msra.mxu0 %v430_v28 }
  0x1d   :  { %406 = vmatprep.subr.bf16.mxu0 %v433_v0 }
  0x1f   :  { %389 = vmatpush3.bf16.msra.mxu1 %v424_v12 }
  0x20   :  { %407 = vmatpush3.bf16.msra.mxu0 %v431_v29 }
  0x21   :  { %408 = vmatprep.subr.bf16.mxu0 %v433_v0 }
  0x24   :  { %409 = vmatpush3.bf16.msra.mxu0 %v432_v30 }
  0xc6   :  { %v83_v19 = vpop.f32.mrf.mxu0 }
  0xc7   :  { %v84_v21 = vadd.f32 %v327_v18, %v83_v19 }
  0xc8   :  { %v372_v20 = vpop.f32.mrf.mxu0 }
  0xc9   :  { %v90_v25 = vmax.f32 %v84_v21, 0.0 }
  0xca   :  { %v86_v22 = vpop.f32.mrf.mxu0 }
  0xcb   :  { %v87_v23 = vadd.f32 %v327_v18, %v86_v22 }
  0xcc   :  { %v373_v24 = vpop.f32.mrf.mxu0 }
  0xcd   :  { %v91_v26 = vmax.f32 %v87_v23, 0.0 }
  0xcf   :  { %v92_v27 = vpack.c.bf16 %v91_v26, %v90_v25 }
  0xd1   :  { %391 = vmatmul.mubr.bf16.vlgmr.msra.gmra.mxu1 %v92_v27 }
 0x191   :  { %v198_v32 = vpop.f32.mrf.mxu1 }
 0x192   :  { %v199_v34 = vadd.f32 %v330_v31, %v198_v32 }
 0x193   :  { %v392_v33 = vpop.f32.mrf.mxu1 }
 0x194   :  { %v205_v38 = vmax.f32 %v199_v34, 0.0 }
 0x195   :  { %v201_v35 = vpop.f32.mrf.mxu1 }
 0x196   :  { %v202_v36 = vadd.f32 %v330_v31, %v201_v35 }
 0x197   :  { %v393_v37 = vpop.f32.mrf.mxu1 }
 0x198   :  { %v206_v39 = vmax.f32 %v202_v36, 0.0 }
 0x19a   :  { %v207_v40 = vpack.c.bf16 %v206_v39, %v205_v38 }
 0x19c   :  { %411 = vmatmul.mubr.bf16.vlgmr.msra.gmra.mxu0 %v207_v40 }
 0x25c   :  { %v313_v42 = vpop.f32.mrf.mxu0 }
 0x25d   :  { %v314_v43 = vadd.f32 %v339_v41, %v313_v42 }
 0x25e   :  { %v412_v44 = vpop.f32.mrf.mxu0 }
 0x25f   :  { %321 = vst.msk [vmem:[%s577_s7] sm:$0xff] %vm320_vm2, %v314_v43 }
 0x260   :  { %v316_v45 = vpop.f32.mrf.mxu0 }
 0x261   :  { %v317_v46 = vadd.f32 %v339_v41, %v316_v45 }
 0x262   :  { %v413_v47 = vpop.f32.mrf.mxu0 }
 0x263   :  { %322 = vst.msk [vmem:[%s577_s7 + $0x8] sm:$0xff] %vm320_vm2, %v317_v46 }

</bundles_post_ra>
